<compile_context>
chip_gen: v7x
topology: tpu7x:2x2x1
jax: 0.10.0
libtpu: 0.0.40
codegen_flags: <defaults>
</compile_context>

<pallas_src>
import jax
import jax.numpy as jnp
from jax import lax
from jax.experimental import pallas as pl
from jax.experimental.pallas import tpu as pltpu


# Contract both minor dims: (m, k) x (n, k) -> (m, n)  (A @ B^T on the MXU).
_NT_DIMS = (((1,), (1,)), ((), ()))


def _build_kernel(tsub, n_sub):
    """Kernel over one (tb, n_in) batch block, tb = n_sub * tsub."""

    def kernel(x_ref,                      # (tb, n_in)  natural-layout input block
               w1_ref, b1_ref,             # (h1, n_in), (h1, 1)
               w2_ref, b2_ref,             # (h2, h1),   (h2, 1)
               w3_ref, b3_ref,             # (h3, h2),   (h3, 1)
               w4_ref, b4_ref,             # (h3, 1),    (1, 1)
               o_ref):                     # (1, tb)     lane-dense output row
        for j in range(n_sub):             # static, fully-unrolled sub-tile loop
            xs = x_ref[pl.ds(j * tsub, tsub), :]              # (tsub, n_in)

            # layer 1 + ReLU. NT matmul puts the batch on lanes "for free":
            # (h1, n_in) x (tsub, n_in) -> (h1, tsub), f32 accumulate.
            h = lax.dot_general(w1_ref[...], xs, _NT_DIMS,
                                preferred_element_type=jnp.float32)
            h = jnp.maximum(h + b1_ref[...], 0.0)

            # layer 2 + ReLU: (h2, h1) @ (h1, tsub)
            h = jnp.dot(w2_ref[...], h, preferred_element_type=jnp.float32)
            h = jnp.maximum(h + b2_ref[...], 0.0)

            # layer 3 + ReLU: (h3, h2) @ (h2, tsub)
            h = jnp.dot(w3_ref[...], h, preferred_element_type=jnp.float32)
            h = jnp.maximum(h + b3_ref[...], 0.0)

            # layer 4 (width-1 out) + LeakyReLU(0.2): VPU multiply + sublane
            # (XLU) reduction -> lane-dense (1, tsub) row; no N=1 matmul and no
            # masked (tsub, 1) stores.
            y = jnp.sum(h * w4_ref[...], axis=0, keepdims=True) + b4_ref[...]
            y = jnp.where(y >= 0.0, y, 0.2 * y)

            o_ref[:, pl.ds(j * tsub, tsub)] = y.astype(o_ref.dtype)

    return kernel


def _round_up(n, m):
    return ((n + m - 1) // m) * m


def mlp_forward(x, params, *, tb=1024):
    """x: (B, n_inputs). params: PyTorch-layout [(W (out,in), b (out,)), ...] x4."""
    (w1, b1), (w2, b2), (w3, b3), (w4, b4) = params
    B, n_in = x.shape

    # Clamp the batch tile to the actual workload (multiple of the 128-lane width).
    tb = max(128, min(_round_up(tb, 128), _round_up(B, 128)))
    n_tiles = pl.cdiv(B, tb)
    b_pad = n_tiles * tb

    # Inner lane sub-tile: bound live activation size (<= 32 x 512 f32 = 16 vregs).
    if tb % 512 == 0:
        tsub = 512
    elif tb % 256 == 0:
        tsub = 256
    else:
        tsub = 128
    n_sub = tb // tsub

    # Compute dtype follows x (f32 here); elementwise work always stays f32.
    cdt = x.dtype if x.dtype == jnp.bfloat16 else jnp.float32

    # Tiny (<= few KB) weight/bias reshapes; these blocks are grid-invariant and
    # stay VMEM-resident for the whole call.
    w1c, w2c, w3c = (w.astype(cdt) for w in (w1, w2, w3))
    b1c, b2c, b3c = (b.reshape(-1, 1).astype(jnp.float32) for b in (b1, b2, b3))
    w4c = w4.reshape(-1, 1).astype(jnp.float32)   # (h3, 1) column
    b4c = b4.reshape(1, 1).astype(jnp.float32)    # (1, 1)

    def resident(a):                               # full-extent, grid-invariant block
        return pl.BlockSpec(a.shape, lambda i: (0, 0))

    out = pl.pallas_call(
        _build_kernel(tsub, n_sub),
        out_shape=jax.ShapeDtypeStruct((1, b_pad), jnp.float32),
        grid_spec=pltpu.PrefetchScalarGridSpec(
            num_scalar_prefetch=0,
            grid=(n_tiles,),
            in_specs=[pl.BlockSpec((tb, n_in), lambda i: (i, 0)),
                      resident(w1c), resident(b1c),
                      resident(w2c), resident(b2c),
                      resident(w3c), resident(b3c),
                      resident(w4c), resident(b4c)],
            out_specs=pl.BlockSpec((1, tb), lambda i: (0, i)),
        ),
        compiler_params=pltpu.CompilerParams(
            dimension_semantics=("parallel",)),
    )(x, w1c, b1c, w2c, b2c, w3c, b3c, w4c, b4c)

    # Padded lanes (partial last block) hold garbage rows only; slice them off.
    return out[0, :B].reshape(B, 1).astype(x.dtype)


def init_params(key, n_inputs, h1, h2, h3):
    """PyTorch nn.Linear layout: W (out, in), b (out,), U(-1/sqrt(in), 1/sqrt(in))."""
    dims = [(n_inputs, h1), (h1, h2), (h2, h3), (h3, 1)]
    params = []
    for fin, fout in dims:
        key, kw, kb = jax.random.split(key, 3)
        bound = 1.0 / (fin ** 0.5)
        w = jax.random.uniform(kw, (fout, fin), jnp.float32, -bound, bound)
        b = jax.random.uniform(kb, (fout,), jnp.float32, -bound, bound)
        params.append((w, b))
    return params


def mlp_reference(x, params):
    """Pure-f32 reference matching the PyTorch module."""
    hp = jax.lax.Precision.HIGHEST
    h = x.astype(jnp.float32)
    for i, (w, b) in enumerate(params):
        h = jnp.dot(h, w.T, precision=hp) + b
        h = jnp.maximum(h, 0.0) if i < 3 else jnp.where(h >= 0.0, h, 0.2 * h)
    return h


if __name__ == "__main__":
    key = jax.random.PRNGKey(0)
    n_inputs, h1, h2, h3 = 16, 32, 32, 16
    kx1, kx2, kp = jax.random.split(key, 3)
    params = init_params(kp, n_inputs, h1, h2, h3)

    # Case 1: B=200 (not a multiple of 128) -> tile clamps to 256, single grid
    # step with a partial (masked) input block.
    x1 = jax.random.normal(kx1, (200, n_inputs), jnp.float32)
    out1 = jax.block_until_ready(mlp_forward(x1, params))
    ref1 = mlp_reference(x1, params)
    assert out1.shape == (200, 1), out1.shape
    assert jnp.allclose(out1, ref1, atol=2e-2, rtol=2e-2), "case 1 mismatch"

    # Case 2: same input, forced tb=128 -> 2 grid steps, last block partial.
    out2 = jax.block_until_ready(mlp_forward(x1, params, tb=128))
    assert jnp.allclose(out2, ref1, atol=2e-2, rtol=2e-2), "case 2 mismatch"

    # Case 3: B=1200 -> default tb=1024 (2 grid steps), two 512-lane inner
    # sub-tiles per step; still tiny (~75 KB of input).
    x3 = jax.random.normal(kx2, (1200, n_inputs), jnp.float32)
    out3 = jax.block_until_ready(mlp_forward(x3, params))
    ref3 = mlp_reference(x3, params)
    assert out3.shape == (1200, 1), out3.shape
    assert jnp.allclose(out3, ref3, atol=2e-2, rtol=2e-2), "case 3 mismatch"

    print("KERNEL_OK")
</pallas_src>

<mosaic_0001>
module attributes {stable_mosaic.version = 11 : i64} {
  func.func @kernel(%arg0: i32, %arg1: memref<256x16xf32, #tpu.memory_space<vmem>>, %arg2: memref<32x16xf32, #tpu.memory_space<vmem>>, %arg3: memref<32x1xf32, #tpu.memory_space<vmem>>, %arg4: memref<32x32xf32, #tpu.memory_space<vmem>>, %arg5: memref<32x1xf32, #tpu.memory_space<vmem>>, %arg6: memref<16x32xf32, #tpu.memory_space<vmem>>, %arg7: memref<16x1xf32, #tpu.memory_space<vmem>>, %arg8: memref<16x1xf32, #tpu.memory_space<vmem>>, %arg9: memref<1x1xf32, #tpu.memory_space<vmem>>, %arg10: memref<1x256xf32, #tpu.memory_space<vmem>>) attributes {dimension_semantics = [#tpu.dimension_semantics<parallel>], iteration_bounds = array<i64: 1>, scalar_prefetch = 0 : i64, scratch_operands = 0 : i64, tpu.core_type = #tpu.core_type<tc>, window_params = [{transform_indices = @transform_0, window_bounds = array<i64: 256, 16>}, {pipeline_mode = #tpu.pipeline_mode<synchronous>, transform_indices = @transform_1, window_bounds = array<i64: 32, 16>}, {pipeline_mode = #tpu.pipeline_mode<synchronous>, transform_indices = @transform_2, window_bounds = array<i64: 32, 1>}, {pipeline_mode = #tpu.pipeline_mode<synchronous>, transform_indices = @transform_3, window_bounds = array<i64: 32, 32>}, {pipeline_mode = #tpu.pipeline_mode<synchronous>, transform_indices = @transform_4, window_bounds = array<i64: 32, 1>}, {pipeline_mode = #tpu.pipeline_mode<synchronous>, transform_indices = @transform_5, window_bounds = array<i64: 16, 32>}, {pipeline_mode = #tpu.pipeline_mode<synchronous>, transform_indices = @transform_6, window_bounds = array<i64: 16, 1>}, {pipeline_mode = #tpu.pipeline_mode<synchronous>, transform_indices = @transform_7, window_bounds = array<i64: 16, 1>}, {pipeline_mode = #tpu.pipeline_mode<synchronous>, transform_indices = @transform_8, window_bounds = array<i64: 1, 1>}, {transform_indices = @transform_9, window_bounds = array<i64: 1, 256>}]} {
    %c0 = arith.constant 0 : index
    %c0_0 = arith.constant 0 : index
    %0 = vector.load %arg1[%c0, %c0_0] : memref<256x16xf32, #tpu.memory_space<vmem>>, vector<256x16xf32>
    %c0_1 = arith.constant 0 : index
    %c0_2 = arith.constant 0 : index
    %1 = vector.load %arg2[%c0_1, %c0_2] : memref<32x16xf32, #tpu.memory_space<vmem>>, vector<32x16xf32>
    %cst = arith.constant dense<0.000000e+00> : vector<32x256xf32>
    %2 = tpu.matmul %1, %0, %cst {dimension_numbers = #tpu.dot_dimension_numbers<[1], [1], [0], [0], [0, 0, 1, 0], [], []>} : vector<32x16xf32>, vector<256x16xf32>, vector<32x256xf32> -> vector<32x256xf32>
    %c0_3 = arith.constant 0 : index
    %c0_4 = arith.constant 0 : index
    %3 = vector.load %arg3[%c0_3, %c0_4] : memref<32x1xf32, #tpu.memory_space<vmem>>, vector<32x1xf32>
    %4 = vector.broadcast %3 : vector<32x1xf32> to vector<32x256xf32>
    %5 = arith.addf %2, %4 : vector<32x256xf32>
    %cst_5 = arith.constant 0.000000e+00 : f32
    %6 = vector.broadcast %cst_5 : f32 to vector<32x256xf32>
    %7 = arith.maximumf %5, %6 : vector<32x256xf32>
    %c0_6 = arith.constant 0 : index
    %c0_7 = arith.constant 0 : index
    %8 = vector.load %arg4[%c0_6, %c0_7] : memref<32x32xf32, #tpu.memory_space<vmem>>, vector<32x32xf32>
    %cst_8 = arith.constant dense<0.000000e+00> : vector<32x256xf32>
    %9 = tpu.matmul %8, %7, %cst_8 {dimension_numbers = #tpu.dot_dimension_numbers<[1], [0], [0], [1], [0, 0, 1, 1], [], []>} : vector<32x32xf32>, vector<32x256xf32>, vector<32x256xf32> -> vector<32x256xf32>
    %c0_9 = arith.constant 0 : index
    %c0_10 = arith.constant 0 : index
    %10 = vector.load %arg5[%c0_9, %c0_10] : memref<32x1xf32, #tpu.memory_space<vmem>>, vector<32x1xf32>
    %11 = vector.broadcast %10 : vector<32x1xf32> to vector<32x256xf32>
    %12 = arith.addf %9, %11 : vector<32x256xf32>
    %cst_11 = arith.constant 0.000000e+00 : f32
    %13 = vector.broadcast %cst_11 : f32 to vector<32x256xf32>
    %14 = arith.maximumf %12, %13 : vector<32x256xf32>
    %c0_12 = arith.constant 0 : index
    %c0_13 = arith.constant 0 : index
    %15 = vector.load %arg6[%c0_12, %c0_13] : memref<16x32xf32, #tpu.memory_space<vmem>>, vector<16x32xf32>
    %cst_14 = arith.constant dense<0.000000e+00> : vector<16x256xf32>
    %16 = tpu.matmul %15, %14, %cst_14 {dimension_numbers = #tpu.dot_dimension_numbers<[1], [0], [0], [1], [0, 0, 1, 1], [], []>} : vector<16x32xf32>, vector<32x256xf32>, vector<16x256xf32> -> vector<16x256xf32>
    %c0_15 = arith.constant 0 : index
    %c0_16 = arith.constant 0 : index
    %17 = vector.load %arg7[%c0_15, %c0_16] : memref<16x1xf32, #tpu.memory_space<vmem>>, vector<16x1xf32>
    %18 = vector.broadcast %17 : vector<16x1xf32> to vector<16x256xf32>
    %19 = arith.addf %16, %18 : vector<16x256xf32>
    %cst_17 = arith.constant 0.000000e+00 : f32
    %20 = vector.broadcast %cst_17 : f32 to vector<16x256xf32>
    %21 = arith.maximumf %19, %20 : vector<16x256xf32>
    %c0_18 = arith.constant 0 : index
    %c0_19 = arith.constant 0 : index
    %22 = vector.load %arg8[%c0_18, %c0_19] : memref<16x1xf32, #tpu.memory_space<vmem>>, vector<16x1xf32>
    %23 = vector.broadcast %22 : vector<16x1xf32> to vector<16x256xf32>
    %24 = arith.mulf %21, %23 : vector<16x256xf32>
    %cst_20 = arith.constant dense<0.000000e+00> : vector<256xf32>
    %25 = vector.multi_reduction <add>, %24, %cst_20 [0] : vector<16x256xf32> to vector<256xf32>
    %26 = vector.shape_cast %25 : vector<256xf32> to vector<1x256xf32>
    %c0_21 = arith.constant 0 : index
    %c0_22 = arith.constant 0 : index
    %27 = vector.load %arg9[%c0_21, %c0_22] : memref<1x1xf32, #tpu.memory_space<vmem>>, vector<1x1xf32>
    %28 = vector.broadcast %27 : vector<1x1xf32> to vector<1x256xf32>
    %29 = arith.addf %26, %28 : vector<1x256xf32>
    %cst_23 = arith.constant 0.000000e+00 : f32
    %30 = vector.broadcast %cst_23 : f32 to vector<1x256xf32>
    %31 = arith.cmpf oge, %29, %30 : vector<1x256xf32>
    %cst_24 = arith.constant 2.000000e-01 : f32
    %32 = vector.broadcast %cst_24 : f32 to vector<1x256xf32>
    %33 = arith.mulf %32, %29 : vector<1x256xf32>
    %34 = arith.select %31, %29, %33 : vector<1x256xi1>, vector<1x256xf32>
    %c0_25 = arith.constant 0 : index
    %c0_26 = arith.constant 0 : index
    %35 = vector.load %arg10[%c0_25, %c0_26] : memref<1x256xf32, #tpu.memory_space<vmem>>, vector<1x256xf32>
    tpu.vector_store %arg10[%c0_25, %c0_26], %34 {strides = array<i32>} : memref<1x256xf32, #tpu.memory_space<vmem>>, vector<1x256xf32>,
    return
  }
  func.func @transform_0(%arg0: i32) -> (i32, i32) {
    %c0_i32 = arith.constant 0 : i32
    %c0_i32_0 = arith.constant 0 : i32
    return %arg0, %c0_i32 : i32, i32
  }
  func.func @transform_1(%arg0: i32) -> (i32, i32) {
    %c0_i32 = arith.constant 0 : i32
    %c0_i32_0 = arith.constant 0 : i32
    %c0_i32_1 = arith.constant 0 : i32
    return %c0_i32, %c0_i32_0 : i32, i32
  }
  func.func @transform_2(%arg0: i32) -> (i32, i32) {
    %c0_i32 = arith.constant 0 : i32
    %c0_i32_0 = arith.constant 0 : i32
    %c0_i32_1 = arith.constant 0 : i32
    return %c0_i32, %c0_i32_0 : i32, i32
  }
  func.func @transform_3(%arg0: i32) -> (i32, i32) {
    %c0_i32 = arith.constant 0 : i32
    %c0_i32_0 = arith.constant 0 : i32
    %c0_i32_1 = arith.constant 0 : i32
    return %c0_i32, %c0_i32_0 : i32, i32
  }
  func.func @transform_4(%arg0: i32) -> (i32, i32) {
    %c0_i32 = arith.constant 0 : i32
    %c0_i32_0 = arith.constant 0 : i32
    %c0_i32_1 = arith.constant 0 : i32
    return %c0_i32, %c0_i32_0 : i32, i32
  }
  func.func @transform_5(%arg0: i32) -> (i32, i32) {
    %c0_i32 = arith.constant 0 : i32
    %c0_i32_0 = arith.constant 0 : i32
    %c0_i32_1 = arith.constant 0 : i32
    return %c0_i32, %c0_i32_0 : i32, i32
  }
  func.func @transform_6(%arg0: i32) -> (i32, i32) {
    %c0_i32 = arith.constant 0 : i32
    %c0_i32_0 = arith.constant 0 : i32
    %c0_i32_1 = arith.constant 0 : i32
    return %c0_i32, %c0_i32_0 : i32, i32
  }
  func.func @transform_7(%arg0: i32) -> (i32, i32) {
    %c0_i32 = arith.constant 0 : i32
    %c0_i32_0 = arith.constant 0 : i32
    %c0_i32_1 = arith.constant 0 : i32
    return %c0_i32, %c0_i32_0 : i32, i32
  }
  func.func @transform_8(%arg0: i32) -> (i32, i32) {
    %c0_i32 = arith.constant 0 : i32
    %c0_i32_0 = arith.constant 0 : i32
    %c0_i32_1 = arith.constant 0 : i32
    return %c0_i32, %c0_i32_0 : i32, i32
  }
  func.func @transform_9(%arg0: i32) -> (i32, i32) {
    %c0_i32 = arith.constant 0 : i32
    %c0_i32_0 = arith.constant 0 : i32
    return %c0_i32, %arg0 : i32, i32
  }
}

</mosaic_0001>

<bundles_post_ra>
// kernel: tpu_custom_call.1
= control target key start
LH: loop header
LB: loop body
LE: loop exit
PB: predicated region body
PF: predicated region fallthrough
CT: control target
= control target key end

     0   :  { %s1094_s0 = inlined_call_operand.vmem [shape: f32[200,16], index: 0, kind: input, shape index: {}]   ;;  %s1095_s1 = inlined_call_operand.vmem [shape: f32[32,16], index: 1, kind: input, shape index: {}]   ;;  %s1096_s2 = inlined_call_operand.vmem [shape: f32[32,1], index: 2, kind: input, shape index: {}]   ;;  %s1097_s3 = inlined_call_operand.vmem [shape: f32[32,32], index: 3, kind: input, shape index: {}]   ;;  %s1098_s4 = inlined_call_operand.vmem [shape: f32[32,1], index: 4, kind: input, shape index: {}]   ;;  %s1099_s5 = inlined_call_operand.vmem [shape: f32[16,32], index: 5, kind: input, shape index: {}]   ;;  %s1100_s6 = inlined_call_operand.vmem [shape: f32[16,1], index: 6, kind: input, shape index: {}]   ;;  %s1101_s7 = inlined_call_operand.vmem [shape: f32[16,1], index: 7, kind: input, shape index: {}]   ;;  %s1102_s8 = inlined_call_operand.<no memory space> [shape: f32[1,1], index: 8, kind: input, shape index: {}]   ;;  %s1103_s9 = inlined_call_operand.hbm [shape: f32[1,256], index: 9, kind: output, shape index: {}]  }
   0x1   :  { %v14_v0 = vstv %s1102_s8 }
   0x2   :  { %15 = vst [vmem:[#allocation2] sm:$0x1] %v14_v0 }
   0x3   :  { %v51_v1 = vld [vmem:[%s1094_s0 + $0x80] sm:$0xff]  ;;  %v52_v2 = vld [vmem:[%s1094_s0 + $0x88] sm:$0xff]  ;;  %vm95_vm0 = vcmask 130048   ;;  %v53_v7 = vld [vmem:[%s1094_s0 + $0x90] sm:$0xff]  ;;  %v801_v8 = vmov 0  }
   0x4   :  { %v35_v3 = vld [vmem:[%s1094_s0] sm:$0xff]  ;;  %v707_v4 = vpack.c.bf16 %v52_v2, %v51_v1  ;;  %vm869_vm1 = vmpackc.low %vm95_vm0, %vm95_vm0  ;;  %v36_v6 = vld [vmem:[%s1094_s0 + $0x8] sm:$0xff]  ;;  %775 = vset.pattern.permute.xlu0 %v801_v8  ;;  %776 = vset.pattern.permute.xlu1 %v801_v8 }
   0x5   :  { %v710_v9 = vpack.c.bf16 %v36_v6, %v35_v3  ;;  %v54_v10 = vld [vmem:[%s1094_s0 + $0x98] sm:$0xff]  ;;  %v37_v12 = vld [vmem:[%s1094_s0 + $0x10] sm:$0xff]  ;;  %v55_v14 = vld [vmem:[%s1094_s0 + $0xa0] sm:$0xff] }
   0x6   :  { %709 = vmatprep.subr.msk.bf16.mxu0 %vm869_vm1, %v707_v4  ;;  %v713_v11 = vpack.c.bf16 %v54_v10, %v53_v7  ;;  %v38_v13 = vld [vmem:[%s1094_s0 + $0x18] sm:$0xff]  ;;  %v56_v15 = vld [vmem:[%s1094_s0 + $0xa8] sm:$0xff]  ;;  %v903_v18 = vld [vmem:[%s1095_s1] sm:$0xff] }
   0x7   :  { %712 = vmatpush3.bf16.xpose.msk.msra.mxu0 %vm869_vm1, %v710_v9  ;;  %v716_v16 = vpack.c.bf16 %v38_v13, %v37_v12  ;;  %v719_v17 = vpack.c.bf16 %v56_v15, %v55_v14  ;;  %699 = vmatprep.mubr.msk.f32.mxu0 %vm95_vm0, %v903_v18  ;;  %v71_v19 = vld [vmem:[%s1096_s2] sm:$0xff]  ;;  %v40_v21 = vld [vmem:[%s1094_s0 + $0x28] sm:$0xff]  ;;  %v73_v22 = vld [vmem:[%s1096_s2 + $0x10] sm:$0xff] }
   0x8   :  { %715 = vmatprep.subr.msk.bf16.mxu0 %vm869_vm1, %v713_v11  ;;  %v39_v20 = vld [vmem:[%s1094_s0 + $0x20] sm:$0xff]  ;;  %77 = vperm.xlu0 %775, %v71_v19   ;;  %v57_v23 = vld [vmem:[%s1094_s0 + $0xb0] sm:$0xff]  ;;  %v58_v24 = vld [vmem:[%s1094_s0 + $0xb8] sm:$0xff] }
   0x9   :  { %v72_v25 = vld [vmem:[%s1096_s2 + $0x8] sm:$0xff]  ;;  %87 = vperm.xlu1 %776, %v73_v22   ;;  %v74_v26 = vld [vmem:[%s1096_s2 + $0x18] sm:$0xff]  ;;  %v722_v27 = vpack.c.bf16 %v40_v21, %v39_v20 }
   0xf   :  { %718 = vmatpush3.bf16.xpose.msk.msra.mxu0 %vm869_vm1, %v716_v16 }
  0x10   :  { %721 = vmatprep.subr.msk.bf16.mxu0 %vm869_vm1, %v719_v17 }
  0x11   :  { %16 = vsyncpa [#allocation4], 0  ;;  %v725_v28 = vpack.c.bf16 %v58_v24, %v57_v23  ;;  %82 = vperm.xlu0 %775, %v72_v25   ;;  %v305_v29 = vld [vmem:[%s1098_s4] sm:$0xff]  ;;  %92 = vperm.xlu1 %776, %v74_v26   ;;  %v306_v30 = vld [vmem:[%s1098_s4 + $0x8] sm:$0xff]  ;;  %v802_v4 = vmov 0.0   ;;  %vm329_vm2 = vcmask 261120  }
  0x12   :  { %v41_v31 = vld [vmem:[%s1094_s0 + $0x30] sm:$0xff]  ;;  %v42_v32 = vld [vmem:[%s1094_s0 + $0x38] sm:$0xff]  ;;  %v59_v33 = vld [vmem:[%s1094_s0 + $0xc0] sm:$0xff]  ;;  %406 = vmatprep.mubr.f32.mxu1 %v802_v4 }
  0x13   :  { %v60_v34 = vld [vmem:[%s1094_s0 + $0xc8] sm:$0xff]  ;;  %v307_v35 = vld [vmem:[%s1098_s4 + $0x10] sm:$0xff]  ;;  %v308_v36 = vld [vmem:[%s1098_s4 + $0x18] sm:$0xff]  ;;  %v728_v37 = vpack.c.bf16 %v42_v32, %v41_v31 }
  0x14   :  { %v731_v38 = vpack.c.bf16 %v60_v34, %v59_v33  ;;  %v441_v39 = vld [vmem:[%s1100_s6] sm:$0xff]  ;;  %v442_v40 = vld [vmem:[%s1100_s6 + $0x8] sm:$0xff]  ;;  %v61_v43 = vld [vmem:[%s1094_s0 + $0xd0] sm:$0xff] }
  0x15   :  { %311 = vperm.xlu0 %775, %v305_v29   ;;  %316 = vperm.xlu1 %776, %v306_v30   ;;  %v43_v41 = vld [vmem:[%s1094_s0 + $0x40] sm:$0xff]  ;;  %v44_v42 = vld [vmem:[%s1094_s0 + $0x48] sm:$0xff]  ;;  %v62_v44 = vld [vmem:[%s1094_s0 + $0xd8] sm:$0xff] }
  0x16   :  { %v540_v45 = vld [vmem:[%s1101_s7] sm:$0xff]  ;;  %v541_v46 = vld [vmem:[%s1101_s7 + $0x8] sm:$0xff]  ;;  %v734_v47 = vpack.c.bf16 %v44_v42, %v43_v41  ;;  %v737_v48 = vpack.c.bf16 %v62_v44, %v61_v43  ;;  %v45_v50 = vld [vmem:[%s1094_s0 + $0x50] sm:$0xff] }
  0x17   :  { %724 = vmatpush3.bf16.xpose.msk.msra.mxu0 %vm869_vm1, %v722_v27  ;;  %v570_v49 = vld [vmem:[#allocation2] sm:$0x1]  ;;  %v46_v51 = vld [vmem:[%s1094_s0 + $0x58] sm:$0xff]  ;;  %v64_v53 = vld [vmem:[%s1094_s0 + $0xe8] sm:$0xff] }
  0x18   :  { %727 = vmatprep.subr.msk.bf16.mxu0 %vm869_vm1, %v725_v28  ;;  %v63_v52 = vld [vmem:[%s1094_s0 + $0xe0] sm:$0xff]  ;;  %v740_v54 = vpack.c.bf16 %v46_v51, %v45_v50  ;;  %v48_v57 = vld [vmem:[%s1094_s0 + $0x68] sm:$0xff]  ;;  %v65_v58 = vld [vmem:[%s1094_s0 + $0xf0] sm:$0xff] }
  0x19   :  { %321 = vperm.xlu0 %775, %v307_v35   ;;  %326 = vperm.xlu1 %776, %v308_v36   ;;  %v743_v55 = vpack.c.bf16 %v64_v53, %v63_v52  ;;  %v47_v56 = vld [vmem:[%s1094_s0 + $0x60] sm:$0xff]  ;;  %v66_v59 = vld [vmem:[%s1094_s0 + $0xf8] sm:$0xff]  ;;  %v49_v62 = vld [vmem:[%s1094_s0 + $0x70] sm:$0xff] }
  0x1a   :  { %v746_v60 = vpack.c.bf16 %v48_v57, %v47_v56  ;;  %v749_v61 = vpack.c.bf16 %v66_v59, %v65_v58  ;;  %v50_v63 = vld [vmem:[%s1094_s0 + $0x78] sm:$0xff]  ;;  %v68_v1 = vld [vmem:[%s1095_s1 + $0x8] sm:$0xff]  ;;  %v69_v2 = vld [vmem:[%s1095_s1 + $0x10] sm:$0xff] }
  0x1b   :  { %v752_v0 = vpack.c.bf16 %v50_v63, %v49_v62  ;;  %v70_v3 = vld [vmem:[%s1095_s1 + $0x18] sm:$0xff] }
  0x1d   :  { %445 = vperm.xlu0 %775, %v441_v39   ;;  %450 = vperm.xlu1 %776, %v442_v40   ;;  %v303_v39 = vld [vmem:[%s1097_s3 + $0x10] sm:$0xff]  ;;  %v304_v40 = vld [vmem:[%s1097_s3 + $0x18] sm:$0xff] }
  0x1f   :  { %730 = vmatpush3.bf16.xpose.msk.msra.mxu0 %vm869_vm1, %v728_v37  ;;  %v301_v37 = vld [vmem:[%s1097_s3] sm:$0xff] }
  0x20   :  { %733 = vmatprep.subr.msk.bf16.mxu0 %vm869_vm1, %v731_v38  ;;  %v302_v38 = vld [vmem:[%s1097_s3 + $0x8] sm:$0xff] }
  0x21   :  { %544 = vperm.xlu0 %775, %v540_v45   ;;  %549 = vperm.xlu1 %776, %v541_v46  }
  0x25   :  { %573 = vperm.xlu0 %775, %v570_v49  }
  0x27   :  { %736 = vmatpush3.bf16.xpose.msk.msra.mxu0 %vm869_vm1, %v734_v47 }
  0x28   :  { %739 = vmatprep.subr.msk.bf16.mxu0 %vm869_vm1, %v737_v48 }
  0x2f   :  { %742 = vmatpush3.bf16.xpose.msk.msra.mxu0 %vm869_vm1, %v740_v54 }
  0x30   :  { %745 = vmatprep.subr.msk.bf16.mxu0 %vm869_vm1, %v743_v55 }
  0x37   :  { %748 = vmatpush3.bf16.xpose.msk.msra.mxu0 %vm869_vm1, %v746_v60 }
  0x38   :  { %751 = vmatprep.subr.msk.bf16.mxu0 %vm869_vm1, %v749_v61 }
  0x3f   :  { %754 = vmatpush3.bf16.xpose.msk.msra.mxu0 %vm869_vm1, %v752_v0 }
  0x46   :  { %700 = vmatmul.mubr.msk.f32.vlgmr.msra.gmra.mrb[0].mxu0 %vm95_vm0, %v903_v18 }
  0x47   :  { %701 = vmatprep.mubr.msk.f32.mxu0 %vm95_vm0, %v68_v1 }
  0x4a   :  { %702 = vmatmul.mubr.msk.f32.gmra.mrb[2].mxu0 %vm95_vm0, %v68_v1 }
  0x4b   :  { %703 = vmatprep.mubr.msk.f32.mxu0 %vm95_vm0, %v69_v2 }
  0x4e   :  { %704 = vmatmul.mubr.msk.f32.gmra.mrb[4].mxu0 %vm95_vm0, %v69_v2 }
  0x4f   :  { %705 = vmatprep.mubr.msk.f32.mxu0 %vm95_vm0, %v70_v3 }
  0x52   :  { %706 = vmatmul.mubr.msk.f32.gmra.mrb[6].mxu0 %vm95_vm0, %v70_v3 }
  0x87   :  { %v78_v5 = vpop.permute.xlu0 %77 }
  0x88   :  { %v88_v14 = vpop.permute.xlu1 %87 }
  0x90   :  { %v83_v9 = vpop.permute.xlu0 %82  ;;  %v93_v25 = vpop.permute.xlu1 %92 }
  0x94   :  { %v312_v43 = vpop.permute.xlu0 %311  ;;  %v317_v45 = vpop.permute.xlu1 %316 }
  0x98   :  { %v322_v58 = vpop.permute.xlu0 %321  ;;  %v327_v61 = vpop.permute.xlu1 %326 }
 0x119   :  { %v270_v6 = vpop.f32.mrb[0].mxu0 }
 0x11a   :  { %v272_v7 = vpop.f32.mrb[1].mxu0  ;;  %v271_v8 = vadd.f32 %v270_v6, %v78_v5 }
 0x11b   :  { %v273_v10 = vadd.f32 %v272_v7, %v78_v5 }
 0x11c   :  { %v293_v16 = vmax.f32 %v271_v8, 0.0 }
 0x11d   :  { %v276_v11 = vpop.f32.mrb[2].mxu0  ;;  %v294_v18 = vmax.f32 %v273_v10, 0.0  ;;  %v439_v10 = vld [vmem:[%s1099_s5] sm:$0xff] }
 0x11e   :  { %v277_v12 = vadd.f32 %v276_v11, %v83_v9  ;;  %v278_v13 = vpop.f32.mrb[3].mxu0  ;;  %v440_v11 = vld [vmem:[%s1099_s5 + $0x8] sm:$0xff]  ;;  %s804_s5 = smov [#allocation3]  }
 0x11f   :  { %v279_v15 = vadd.f32 %v278_v13, %v83_v9  ;;  %s617_s18 = sshll.u32 %s804_s5, 4  ;;  %s618_s18 = int_to_ptr.vmem [resolvable:$true] %s617_s18 }
 0x120   :  { %v295_v17 = vmax.f32 %v277_v12, 0.0  ;;  %v446_v12 = vpop.permute.xlu0 %445  ;;  %s777_s19 = scalar_lea.vmem %s618_s18, 32  ;;  %p782_p1 = scmp.lt.s32.totalorder %s618_s18, %s618_s18 }
 0x121   :  { %v296_v19 = vmax.f32 %v279_v15, 0.0  ;;  %v282_v20 = vpop.f32.mrb[4].mxu0  ;;  %p778_p0 = scmp.ne.s32.totalorder %s618_s18, %s777_s19  ;;  %p783_p2 = scmp.lt.s32.totalorder %s777_s19, %s777_s19 }
 0x122   :  { %v284_v21 = vpop.f32.mrb[5].mxu0  ;;  %v757_v22 = vpack.c.bf16 %v295_v17, %v293_v16  ;;  %v283_v24 = vadd.f32 %v282_v20, %v88_v14  ;;  %v451_v16 = vpop.permute.xlu1 %450 }
 0x123   :  { %v755_v23 = vpack.c.bf16 %v296_v19, %v294_v18  ;;  %v285_v26 = vadd.f32 %v284_v21, %v88_v14  ;;  %p784_p3 = por %p783_p2, %p782_p1 }
 0x124   :  { %v297_v31 = vmax.f32 %v283_v24, 0.0 }
 0x125   :  { %v288_v27 = vpop.f32.mrb[6].mxu0  ;;  %756 = vmatprep.subr.bf16.mxu1 %v755_v23  ;;  %v298_v33 = vmax.f32 %v285_v26, 0.0  ;;  %p785_p4 = pnand %p784_p3, %p778_p0 }
 0x126   :  { %v289_v28 = vadd.f32 %v288_v27, %v93_v25  ;;  %v290_v29 = vpop.f32.mrb[7].mxu0  ;;  %758 = vmatpush1.bf16.msra.mxu1 %v757_v22 }
 0x127   :  { %v291_v30 = vadd.f32 %v290_v29, %v93_v25  ;;  %v550_v25 = vpop.permute.xlu1 %549 }
 0x128   :  { %v299_v32 = vmax.f32 %v289_v28, 0.0 }
 0x129   :  { %v300_v34 = vmax.f32 %v291_v30, 0.0 }
 0x12a   :  { %v761_v35 = vpack.c.bf16 %v299_v32, %v297_v31  ;;  %v576_v31 = vlaneseq }
 0x12b   :  { %v759_v36 = vpack.c.bf16 %v300_v34, %v298_v33 }
 0x12c   :  { %vm608_vm5 = vcmp.lt.s32.totalorder %v576_v31, 256 }
 0x12d   :  { %760 = vmatprep.subr.bf16.mxu1 %v759_v36  ;;  %v577_v36 = vshrl.u32 %v576_v31, 7 }
 0x12e   :  { %762 = vmatpush1.bf16.msra.mxu1 %v761_v35 }
 0x131   :  { %661 = vmatmul.mubr.msk.f32.vlgmr.msra.gmra.mrb[0].mxu1 %vm329_vm2, %v301_v37 }
 0x132   :  { %412 = vmatprep.mubr.f32.mxu1 %v802_v4 }
 0x135   :  { %662 = vmatmul.mubr.msk.f32.gmra.mrb[2].mxu1 %vm329_vm2, %v302_v38 }
 0x136   :  { %418 = vmatprep.mubr.f32.mxu1 %v802_v4 }
 0x139   :  { %663 = vmatmul.mubr.msk.f32.gmra.mrb[4].mxu1 %vm329_vm2, %v303_v39 }
 0x13a   :  { %424 = vmatprep.mubr.f32.mxu1 %v802_v4 }
 0x13d   :  { %664 = vmatmul.mubr.msk.f32.gmra.mrb[6].mxu1 %vm329_vm2, %v304_v40 }
 0x13e   :  { %523 = vmatprep.mubr.f32.mxu1 %v802_v4 }
 0x204   :  { %v408_v41 = vpop.f32.mrb[0].mxu1 }
 0x205   :  { %v410_v42 = vpop.f32.mrb[1].mxu1  ;;  %v409_v44 = vadd.f32 %v408_v41, %v312_v43  ;;  %v578_v41 = vsub.s32 0, %v577_v36 }
 0x206   :  { %v411_v46 = vadd.f32 %v410_v42, %v312_v43 }
 0x207   :  { %v431_v51 = vmax.f32 %v409_v44, 0.0 }
 0x208   :  { %v414_v47 = vpop.f32.mrb[2].mxu1  ;;  %v432_v53 = vmax.f32 %v411_v46, 0.0  ;;  %v803_v46 = vmov 1966171168  }
 0x209   :  { %v415_v48 = vadd.f32 %v414_v47, %v317_v45  ;;  %v416_v49 = vpop.f32.mrb[3].mxu1  ;;  %v592_v47 = vunpack.c.l.s4 %v803_v46 }
 0x20a   :  { %v417_v50 = vadd.f32 %v416_v49, %v317_v45 }
 0x20b   :  { %v433_v52 = vmax.f32 %v415_v48, 0.0 }
 0x20c   :  { %v434_v54 = vmax.f32 %v417_v50, 0.0  ;;  %v420_v55 = vpop.f32.mrb[4].mxu1 }
 0x20d   :  { %v765_v56 = vpack.c.bf16 %v433_v52, %v431_v51  ;;  %v422_v57 = vpop.f32.mrb[5].mxu1  ;;  %v421_v60 = vadd.f32 %v420_v55, %v322_v58 }
 0x20e   :  { %v763_v59 = vpack.c.bf16 %v434_v54, %v432_v53  ;;  %v423_v62 = vadd.f32 %v422_v57, %v322_v58  ;;  %v593_v53 = vunpack.c.0.s8 %v592_v47 }
 0x20f   :  { %v435_v3 = vmax.f32 %v421_v60, 0.0 }
 0x210   :  { %v426_v63 = vpop.f32.mrb[6].mxu1  ;;  %764 = vmatprep.subr.bf16.mxu1 %v763_v59  ;;  %v436_v6 = vmax.f32 %v423_v62, 0.0  ;;  %v596_v58 = vsub.s32 %v593_v53, %v577_v36 }
 0x211   :  { %v427_v0 = vadd.f32 %v426_v63, %v327_v61  ;;  %v428_v1 = vpop.f32.mrb[7].mxu1  ;;  %766 = vmatpush1.bf16.msra.mxu1 %v765_v56 }
 0x212   :  { %v429_v2 = vadd.f32 %v428_v1, %v327_v61 }
 0x213   :  { %v437_v5 = vmax.f32 %v427_v0, 0.0 }
 0x214   :  { %v438_v7 = vmax.f32 %v429_v2, 0.0 }
 0x215   :  { %v769_v8 = vpack.c.bf16 %v437_v5, %v435_v3 }
 0x216   :  { %v767_v9 = vpack.c.bf16 %v438_v7, %v436_v6 }
 0x218   :  { %768 = vmatprep.subr.bf16.mxu1 %v767_v9 }
 0x219   :  { %770 = vmatpush1.bf16.msra.mxu1 %v769_v8 }
 0x21c   :  { %665 = vmatmul.mubr.msk.f32.vlgmr.msra.gmra.mrb[8].mxu1 %vm329_vm2, %v439_v10 }
 0x21d   :  { %529 = vmatprep.mubr.f32.mxu1 %v802_v4  ;;  %v545_v4 = vpop.permute.xlu0 %544 }
 0x220   :  { %666 = vmatmul.mubr.msk.f32.gmra.mrb[10].mxu1 %vm329_vm2, %v440_v11 }
 0x221   :  { %v574_v43 = vpop.permute.xlu0 %573 }
 0x222   :  { %v579_v49 = vrot.slane %v574_v43, %v578_v41 }
 0x2ef   :  { %v525_v13 = vpop.f32.mrb[8].mxu1 }
 0x2f0   :  { %v526_v14 = vadd.f32 %v525_v13, %v446_v12  ;;  %v527_v15 = vpop.f32.mrb[9].mxu1 }
 0x2f1   :  { %v528_v17 = vadd.f32 %v527_v15, %v446_v12 }
 0x2f2   :  { %v536_v19 = vmax.f32 %v526_v14, 0.0 }
 0x2f3   :  { %v531_v18 = vpop.f32.mrb[10].mxu1  ;;  %v537_v22 = vmax.f32 %v528_v17, 0.0 }
 0x2f4   :  { %v532_v20 = vadd.f32 %v531_v18, %v451_v16  ;;  %v533_v21 = vpop.f32.mrb[11].mxu1  ;;  %v552_v27 = vmul.f32 %v545_v4, %v536_v19 }
 0x2f5   :  { %v534_v23 = vadd.f32 %v533_v21, %v451_v16  ;;  %v553_v29 = vmul.f32 %v545_v4, %v537_v22 }
 0x2f6   :  { %v538_v24 = vmax.f32 %v532_v20, 0.0 }
 0x2f7   :  { %v539_v26 = vmax.f32 %v534_v23, 0.0 }
 0x2f8   :  { %v554_v28 = vmul.f32 %v550_v25, %v538_v24 }
 0x2f9   :  { %v555_v30 = vmul.f32 %v550_v25, %v539_v26 }
 0x2fa   :  { %v556_v32 = vadd.f32 %v554_v28, %v552_v27 }
 0x2fb   :  { %v563_v33 = vadd.f32 %v555_v30, %v553_v29 }
 0x2fc   :  { %v557_v34 = vrot.slane %v556_v32, 4 }
 0x2fd   :  { %v564_v35 = vrot.slane %v563_v33, 4 }
 0x2fe   :  { %v558_v37 = vadd.f32 %v557_v34, %v556_v32 }
 0x2ff   :  { %v565_v38 = vadd.f32 %v564_v35, %v563_v33 }
 0x300   :  { %v559_v39 = vrot.slane %v558_v37, 2 }
 0x301   :  { %v566_v40 = vrot.slane %v565_v38, 2 }
 0x302   :  { %v560_v42 = vadd.f32 %v559_v39, %v558_v37 }
 0x303   :  { %v567_v44 = vadd.f32 %v566_v40, %v565_v38 }
 0x304   :  { %v561_v45 = vrot.slane %v560_v42, 1 }
 0x305   :  { %v568_v48 = vrot.slane %v567_v44, 1 }
 0x306   :  { %v562_v50 = vadd.f32 %v561_v45, %v560_v42 }
 0x307   :  { %v569_v51 = vadd.f32 %v568_v48, %v567_v44 }
 0x308   :  { %v580_v52 = vadd.f32 %v579_v49, %v562_v50 }
 0x309   :  { %v581_v54 = vadd.f32 %v579_v49, %v569_v51 }
 0x30a   :  { %vm582_vm3 = vcmp.ge.f32.partialorder %v580_v52, 0.0  ;;  %v584_v55 = vmul.f32 0.2, %v580_v52 }
 0x30b   :  { %vm583_vm4 = vcmp.ge.f32.partialorder %v581_v54, 0.0  ;;  %v585_v56 = vmul.f32 0.2, %v581_v54 }
 0x30c   :  { %v586_v57 = vsel %vm582_vm3, %v580_v52, %v584_v55 }
 0x30d   :  { %v587_v59 = vsel %vm583_vm4, %v581_v54, %v585_v56 }
 0x30e   :  { %v590_v60 = vcombine.low %v586_v57, %v587_v59 }
 0x310   :  { %v597_v61 = vrot.slane %v590_v60, %v596_v58 }
 0x312   :  { %v604_v62 = vrot.slane %v597_v61, %v596_v58 }
 0x314   :  { %610 = vst.msk [vmem:[#allocation3] sm:$0x3] %vm608_vm5, %v604_v62 }
 0x315   :  { %788 = shalt.err (!%p785_p4)
}
 0x316   :  { %s789_s22 = scalar_lea.hbm %s1103_s9, 32 }
 0x317   :  { %p790_p5 = scmp.ne.s32.totalorder %s1103_s9, %s789_s22  ;;  %p793_p6 = scmp.lt.u32.totalorder %s789_s22, %s1103_s9 }
 0x319   :  { %p795_p7 = pnand %p793_p6, %p790_p5 }
 0x31b   :  { %798 = shalt.err (!%p795_p7)
}
 0x31c   :  { %620 = dma.vmem_to_hbm [thread:$0]  %s618_s18, 32, %s1103_s9, [#allocation4]  }
 0x31d   :  { %799 = dma.done.wait [#allocation4], 32  }
 0x31e   :  { %800 = vsyncadd [#allocation4], 4294967264 }
 0x31f   :  { %624 = vsyncpa [#allocation4], 1 }

</bundles_post_ra>
